<compile_context>
chip_gen: v6e
topology: v6e:2x2x1
jax: 0.10.0
libtpu: 0.0.40
codegen_flags: <defaults>
</compile_context>

<pallas_src>
import jax
import jax.numpy as jnp
import numpy as np
from jax.experimental import pallas as pl
from jax.experimental.pallas import tpu as pltpu


def _round_up(x, m):
    return (x + m - 1) // m * m


def _proj_kernel(x_ref, w_ref, b_ref, o_ref):
    # 1x1 conv == per-token linear projection: (tm, C) @ (C, E) + (1, E).
    # bf16 (or f32) operands, f32 accumulation; bias added in f32 (v5e-safe).
    acc = jnp.dot(x_ref[...], w_ref[...], preferred_element_type=jnp.float32)
    o_ref[...] = (acc + b_ref[...]).astype(o_ref.dtype)


def _slice_cat(x):
    # Reference-only helper: exact PyTorch semantics of
    # torch.cat([x[...,::2,::2], x[...,1::2,::2], x[...,::2,1::2], x[...,1::2,1::2]], 1)
    return jnp.concatenate(
        [x[..., ::2, ::2], x[..., 1::2, ::2], x[..., ::2, 1::2], x[..., 1::2, 1::2]],
        axis=1,
    )


def _channel_perm(C0):
    """perm[t] = PyTorch channel index of token feature t.

    Token features are laid out row-major over (h2, h1, w2, w1, c0) (what the
    cheap NHWC-based glue produces); the double slice_cat in PyTorch orders
    channels row-major over (w2, h2, w1, h1, c0):
        c_pt = (w2*2 + h2)*4*C0 + (w1*2 + h1)*C0 + c0
    """
    perm = np.empty(16 * C0, dtype=np.int32)
    t = 0
    for h2 in range(2):
        for h1 in range(2):
            for w2 in range(2):
                for w1 in range(2):
                    for c0 in range(C0):
                        perm[t] = ((w2 * 2 + h2) * 4 + (w1 * 2 + h1)) * C0 + c0
                        t += 1
    return perm


def _make_tokens(x, img_size, compute_dtype):
    """slice_cat(slice_cat(x)) + NCHW -> (B*H*W, 16*C0) tokens, as cheap glue.

    Token channel order is (h2, h1, w2, w1, c0); the weight rows are permuted
    to match (see _channel_perm), so the projection result is identical to the
    PyTorch channel ordering.
    """
    B, C0, H0, W0 = x.shape
    H = W = img_size
    # 1) bf16 cast (fused by XLA) + one stock NCHW -> NHWC transpose.
    x_nhwc = jnp.transpose(x.astype(compute_dtype), (0, 2, 3, 1))  # (B, H0, W0, C0)
    # 2) free reshape: H0 -> (i, h2, h1), W0 -> (j, w2, w1).
    x_r = x_nhwc.reshape(B, H, 2, 2, W, 2, 2, C0)  # (b, i, h2, h1, j, w2, w1, c0)
    # 3) cheap permute: trailing (w2, w1, c0) stays contiguous -> inner runs of
    #    4*C0 elements instead of the old 8-D transpose's run of 1.
    tok = jnp.transpose(x_r, (0, 1, 4, 2, 3, 5, 6, 7))  # (b, i, j, h2, h1, w2, w1, c0)
    return tok.reshape(B * H * W, 16 * C0)


def patch_slice_embedding(x, weight, bias, img_size, *, tm=8192, use_bf16=True,
                          out_dtype=None):
    """x: (B, C0, H0, W0) NCHW (PyTorch convention), H0 = W0 = 4*img_size.

    weight: (embed_dim, in_chans, 1, 1)  -- nn.Conv2d(in_chans, embed_dim, 1).weight
    bias:   (embed_dim,)
    Returns (B, H*W, embed_dim) with H = W = img_size (post-slicing resolution).
    out_dtype defaults to the compute dtype (bf16 when use_bf16=True): the
    output is the dominant HBM stream.  Pass out_dtype=jnp.float32 (and/or
    use_bf16=False) to reproduce PyTorch f32 numerics exactly.
    """
    B, C0, H0, W0 = x.shape
    H = W = img_size
    assert H0 == 4 * H and W0 == 4 * W, (
        f"Input image size ({H0 // 4}*{W0 // 4}) doesn't match model input size "
        f"({img_size}*{img_size}).")
    C = 16 * C0                       # in_chans after the two slice/cat steps
    E = weight.shape[0]
    assert weight.shape == (E, C, 1, 1)

    compute_dtype = jnp.bfloat16 if use_bf16 else x.dtype
    if out_dtype is None:
        out_dtype = compute_dtype

    # Glue: one NHWC transpose + cheap permute; tokens in (h2,h1,w2,w1,c0) order.
    tokens = _make_tokens(x, img_size, compute_dtype)
    T = tokens.shape[0]

    # Weight rows permuted to the token channel order; bias stays f32 (added on
    # the f32 accumulator).  Both are tiny and stay resident in VMEM; no K or E
    # padding (kernel is HBM-bound, padding would only add bytes).
    perm = jnp.asarray(_channel_perm(C0))
    w = weight.reshape(E, C)[:, perm].T.astype(compute_dtype)   # (C, E)
    b = bias.reshape(1, E).astype(jnp.float32)

    # Token tile: big enough to amortize the ~0.35us/step pipeline overhead,
    # small enough that the double-buffered (lane-padded) blocks fit the scoped
    # VMEM default on every generation.  cdiv grid + masked ragged last block:
    # no jnp.pad copy of the token matrix, and the output stays exactly (T, E).
    tm_eff = max(16, min(tm, _round_up(T, 16)))
    grid = (pl.cdiv(T, tm_eff),)

    out = pl.pallas_call(
        _proj_kernel,
        out_shape=jax.ShapeDtypeStruct((T, E), out_dtype),
        grid_spec=pltpu.PrefetchScalarGridSpec(
            num_scalar_prefetch=0,
            grid=grid,
            in_specs=[
                pl.BlockSpec((tm_eff, C), lambda i: (i, 0)),   # token tile
                pl.BlockSpec((C, E), lambda i: (0, 0)),        # weight, resident
                pl.BlockSpec((1, E), lambda i: (0, 0)),        # bias, resident
            ],
            out_specs=pl.BlockSpec((tm_eff, E), lambda i: (i, 0)),
        ),
        compiler_params=pltpu.CompilerParams(
            # Megacore / dual-TC sharding of the token axis.
            # TODO(synk): on v7x, verify in xprof that both TensorCores stream;
            # if one is idle, switch this axis to pltpu.CORE_PARALLEL.
            dimension_semantics=("parallel",),
            vmem_limit_bytes=32 * 1024 * 1024,
        ),
    )(tokens, w, b)

    # (T, E) -> (B, H*W, E): free reshape (no T/E padding to slice off).
    return out.reshape(B, H * W, E)
    # TODO(synk): norm_layer is None in the default config; a LayerNorm over E
    # could be fused into the kernel epilogue if needed.
    # TODO(synk): further win: fold the space-to-depth into the kernel
    # (BlockSpec over NHWC row bands + in-VMEM reorder) so the token matrix is
    # never materialized in HBM.


if __name__ == "__main__":
    # Config consistent with the forward pass:
    #   raw input (B, 3, 16, 16) -> two slice steps -> (B, 48, 4, 4)
    #   so in_chans=48, img_size=4, embed_dim=96.
    B, C0, H0, W0 = 2, 3, 16, 16
    in_chans, img_size, embed_dim = 48, 4, 96

    key = jax.random.PRNGKey(0)
    kx, kw, kb = jax.random.split(key, 3)
    x = jax.random.normal(kx, (B, C0, H0, W0), dtype=jnp.float32)
    weight = jax.random.normal(kw, (embed_dim, in_chans, 1, 1), dtype=jnp.float32) * 0.02
    bias = jax.random.normal(kb, (embed_dim,), dtype=jnp.float32) * 0.02

    def reference(x, weight, bias, img_size, cast_bf16):
        # Exact PyTorch semantics via per-op slice/cat (independent of the
        # NHWC-glue + weight-permutation path used in production).
        xs = _slice_cat(_slice_cat(x))
        Bb = xs.shape[0]
        E, C = weight.shape[0], weight.shape[1]
        wm = weight.reshape(E, C)
        if cast_bf16:
            xs = xs.astype(jnp.bfloat16).astype(jnp.float32)
            wm = wm.astype(jnp.bfloat16).astype(jnp.float32)
        ref = jnp.einsum("bchw,ec->bhwe", xs, wm,
                         precision=jax.lax.Precision.HIGHEST) + bias
        return ref.reshape(Bb, img_size * img_size, E)

    # 1) exact-f32 path: strict check of glue ordering + weight permutation.
    out_f32 = jax.block_until_ready(
        patch_slice_embedding(x, weight, bias, img_size,
                              use_bf16=False, out_dtype=jnp.float32))
    assert out_f32.shape == (B, img_size * img_size, embed_dim), out_f32.shape
    ref_f32 = reference(x, weight, bias, img_size, cast_bf16=False)
    np.testing.assert_allclose(np.asarray(out_f32), np.asarray(ref_f32),
                               rtol=1e-3, atol=1e-3)

    # 2) default path (bf16 compute, bf16 output) against a bf16-aware reference.
    out_bf = jax.block_until_ready(
        patch_slice_embedding(x, weight, bias, img_size))
    assert out_bf.shape == (B, img_size * img_size, embed_dim), out_bf.shape
    assert out_bf.dtype == jnp.bfloat16
    ref_bf = reference(x, weight, bias, img_size, cast_bf16=True)
    np.testing.assert_allclose(np.asarray(out_bf, dtype=np.float32),
                               np.asarray(ref_bf), rtol=2e-2, atol=2e-2)

    # 3) ragged T with a multi-step grid (exercises the cdiv grid + masked
    #    last-block writeback that replaced the jnp.pad copy):
    #    (2, 3, 40, 40) -> img_size=10 -> T = 200, tm=128 -> grid=(2,),
    #    last block covers rows 128..199 only.
    x2 = jax.random.normal(kx, (2, 3, 40, 40), dtype=jnp.float32)
    out2 = jax.block_until_ready(
        patch_slice_embedding(x2, weight, bias, 10, tm=128,
                              use_bf16=False, out_dtype=jnp.float32))
    assert out2.shape == (2, 100, embed_dim), out2.shape
    ref2 = reference(x2, weight, bias, 10, cast_bf16=False)
    np.testing.assert_allclose(np.asarray(out2), np.asarray(ref2),
                               rtol=1e-3, atol=1e-3)

    print("KERNEL_OK")
</pallas_src>

<mosaic_0001>
module attributes {stable_mosaic.version = 11 : i64} {
  func.func @_proj_kernel(%arg0: i32, %arg1: memref<32x48xf32, #tpu.memory_space<vmem>>, %arg2: memref<48x96xf32, #tpu.memory_space<vmem>>, %arg3: memref<1x96xf32, #tpu.memory_space<vmem>>, %arg4: memref<32x96xf32, #tpu.memory_space<vmem>>) attributes {dimension_semantics = [#tpu.dimension_semantics<parallel>], iteration_bounds = array<i64: 1>, scalar_prefetch = 0 : i64, scratch_operands = 0 : i64, tpu.core_type = #tpu.core_type<tc>, window_params = [{transform_indices = @transform_0, window_bounds = array<i64: 32, 48>}, {pipeline_mode = #tpu.pipeline_mode<synchronous>, transform_indices = @transform_1, window_bounds = array<i64: 48, 96>}, {pipeline_mode = #tpu.pipeline_mode<synchronous>, transform_indices = @transform_2, window_bounds = array<i64: 1, 96>}, {transform_indices = @transform_3, window_bounds = array<i64: 32, 96>}]} {
    %c0 = arith.constant 0 : index
    %c0_0 = arith.constant 0 : index
    %0 = vector.load %arg1[%c0, %c0_0] : memref<32x48xf32, #tpu.memory_space<vmem>>, vector<32x48xf32>
    %c0_1 = arith.constant 0 : index
    %c0_2 = arith.constant 0 : index
    %1 = vector.load %arg2[%c0_1, %c0_2] : memref<48x96xf32, #tpu.memory_space<vmem>>, vector<48x96xf32>
    %cst = arith.constant dense<0.000000e+00> : vector<32x96xf32>
    %2 = tpu.matmul %0, %1, %cst {dimension_numbers = #tpu.dot_dimension_numbers<[1], [0], [0], [1], [0, 0, 1, 1], [], []>} : vector<32x48xf32>, vector<48x96xf32>, vector<32x96xf32> -> vector<32x96xf32>
    %c0_3 = arith.constant 0 : index
    %c0_4 = arith.constant 0 : index
    %3 = vector.load %arg3[%c0_3, %c0_4] : memref<1x96xf32, #tpu.memory_space<vmem>>, vector<1x96xf32>
    %4 = vector.broadcast %3 : vector<1x96xf32> to vector<32x96xf32>
    %5 = arith.addf %2, %4 : vector<32x96xf32>
    %c0_5 = arith.constant 0 : index
    %c0_6 = arith.constant 0 : index
    %6 = vector.load %arg4[%c0_5, %c0_6] : memref<32x96xf32, #tpu.memory_space<vmem>>, vector<32x96xf32>
    tpu.vector_store %arg4[%c0_5, %c0_6], %5 {strides = array<i32>} : memref<32x96xf32, #tpu.memory_space<vmem>>, vector<32x96xf32>,
    return
  }
  func.func @transform_0(%arg0: i32) -> (i32, i32) {
    %c0_i32 = arith.constant 0 : i32
    %c0_i32_0 = arith.constant 0 : i32
    return %arg0, %c0_i32 : i32, i32
  }
  func.func @transform_1(%arg0: i32) -> (i32, i32) {
    %c0_i32 = arith.constant 0 : i32
    %c0_i32_0 = arith.constant 0 : i32
    %c0_i32_1 = arith.constant 0 : i32
    return %c0_i32, %c0_i32_0 : i32, i32
  }
  func.func @transform_2(%arg0: i32) -> (i32, i32) {
    %c0_i32 = arith.constant 0 : i32
    %c0_i32_0 = arith.constant 0 : i32
    %c0_i32_1 = arith.constant 0 : i32
    return %c0_i32, %c0_i32_0 : i32, i32
  }
  func.func @transform_3(%arg0: i32) -> (i32, i32) {
    %c0_i32 = arith.constant 0 : i32
    %c0_i32_0 = arith.constant 0 : i32
    return %arg0, %c0_i32 : i32, i32
  }
}

</mosaic_0001>

<bundles_post_ra>
// kernel: tpu_custom_call.1
= control target key start
LH: loop header
LB: loop body
LE: loop exit
PB: predicated region body
PF: predicated region fallthrough
CT: control target
= control target key end

     0   :  { %8 = vsyncpa [#allocation3], 0  ;;  %s343_s0 = inlined_call_operand.hbm [shape: f32[32,48], index: 0, kind: input, shape index: {}]   ;;  %s344_s1 = inlined_call_operand.hbm [shape: f32[48,96], index: 1, kind: input, shape index: {}]   ;;  %s345_s2 = inlined_call_operand.vmem [shape: f32[1,96], index: 2, kind: input, shape index: {}]   ;;  %s346_s3 = inlined_call_operand.hbm [shape: f32[32,96], index: 3, kind: output, shape index: {}]  }
   0x1   :  { %9 = vsyncpa [#allocation6], 0 }
   0x2   :  { %10 = vsyncpa [#allocation4], 0  ;;  %s297_s12 = smov [#allocation2]  }
   0x3   :  { %s16_s13 = sshll.u32 %s297_s12, 4  ;;  %s17_s13 = int_to_ptr.vmem [resolvable:$true] %s16_s13 }
   0x4   :  { %s239_s14 = scalar_lea.vmem %s17_s13, 512  ;;  %p244_p1 = scmp.lt.s32.totalorder %s17_s13, %s17_s13 }
   0x5   :  { %p240_p0 = scmp.ne.s32.totalorder %s17_s13, %s239_s14  ;;  %p245_p2 = scmp.lt.s32.totalorder %s239_s14, %s239_s14 }
   0x7   :  { %p246_p3 = por %p245_p2, %p244_p1 }
   0x9   :  { %p247_p4 = pnand %p246_p3, %p240_p0 }
   0xb   :  { %250 = shalt.err (!%p247_p4)
}
   0xc   :  { %s298_s15 = smov 128   ;;  %s299_s16 = smov 8  }
   0xd   :  { %22 = dma.hbm_to_vmem [thread:$0]  %s343_s0, 512, %s17_s13, [#allocation3], %s298_s15, %s298_s15, %s299_s16  }
   0xe   :  { %s300_s19 = smov [#allocation5]  }
   0xf   :  { %s28_s20 = sshll.u32 %s300_s19, 4  ;;  %s29_s20 = int_to_ptr.vmem [resolvable:$true] %s28_s20 }
  0x10   :  { %s259_s21 = scalar_lea.vmem %s29_s20, 768  ;;  %p264_p6 = scmp.lt.s32.totalorder %s29_s20, %s29_s20 }
  0x11   :  { %p260_p5 = scmp.ne.s32.totalorder %s29_s20, %s259_s21  ;;  %p265_p7 = scmp.lt.s32.totalorder %s259_s21, %s259_s21 }
  0x13   :  { %p266_p8 = por %p265_p7, %p264_p6 }
  0x15   :  { %p267_p9 = pnand %p266_p8, %p260_p5 }
  0x17   :  { %270 = shalt.err (!%p267_p9)
}
  0x18   :  { %34 = dma.hbm_to_vmem [thread:$0]  %s344_s1, 768, %s29_s20, [#allocation6], %s298_s15, %s298_s15, %s299_s16  }
  0x19   :  { %291 = dma.done.wait [#allocation3], 512  }
  0x1a   :  { %292 = vsyncadd [#allocation3], 4294966784 }
  0x1b   :  { %293 = dma.done.wait [#allocation6], 768  }
  0x1c   :  { %294 = vsyncadd [#allocation6], 4294966528  ;;  %v52_v0 = vld [vmem:[#allocation5 + $0x28] sm:$0xff]  ;;  %v51_v1 = vld [vmem:[#allocation5 + $0x20] sm:$0xff]  ;;  %vm60_vm0 = vcmask 392192   ;;  %vm158_vm1 = vcmask 785408  }
  0x1d   :  { %196 = vmatprep.subr.mxu0 %v52_v0  ;;  %214 = vmatprep.subr.mxu1 %v52_v0  ;;  %v50_v2 = vld [vmem:[#allocation5 + $0x18] sm:$0xff]  ;;  %v49_v3 = vld [vmem:[#allocation5 + $0x10] sm:$0xff]  ;;  %v48_v4 = vld [vmem:[#allocation5 + $0x8] sm:$0xff]  ;;  %s301_s24 = smov [#allocation7]  }
  0x1e   :  { %197 = vmatpush3.msra.mxu0 %v52_v0  ;;  %220 = vmatpush3.msra.mxu1 %v52_v0  ;;  %v47_v5 = vld [vmem:[#allocation5] sm:$0xff]  ;;  %v45_v7 = vld [vmem:[#allocation2 + $0x10] sm:$0xff]  ;;  %v44_v8 = vld [vmem:[#allocation2 + $0x8] sm:$0xff]  ;;  %s168_s25 = sshll.u32 %s301_s24, 4  ;;  %s169_s25 = int_to_ptr.vmem [resolvable:$true] %s168_s25 }
  0x1f   :  { %198 = vmatprep.subr.mxu0 %v51_v1  ;;  %215 = vmatprep.subr.mxu1 %v51_v1  ;;  %v43_v6 = vld [vmem:[#allocation2] sm:$0xff]  ;;  %v46_v9 = vld [vmem:[#allocation2 + $0x18] sm:$0xff]  ;;  %s271_s26 = scalar_lea.vmem %s169_s25, 512  ;;  %p276_p11 = scmp.lt.s32.totalorder %s169_s25, %s169_s25 }
  0x20   :  { %199 = vmatpush3.msra.mxu0 %v51_v1  ;;  %221 = vmatpush3.msra.mxu1 %v51_v1  ;;  %v181_v10 = vld [vmem:[%s345_s2] ss:$0 sm:$0xff]  ;;  %p272_p10 = scmp.ne.s32.totalorder %s169_s25, %s271_s26  ;;  %p277_p12 = scmp.lt.s32.totalorder %s271_s26, %s271_s26 }
  0x21   :  { %200 = vmatprep.subr.mxu0 %v50_v2  ;;  %216 = vmatprep.subr.mxu1 %v50_v2 }
  0x22   :  { %201 = vmatpush3.msra.mxu0 %v50_v2  ;;  %222 = vmatpush3.msra.mxu1 %v50_v2  ;;  %p278_p13 = por %p277_p12, %p276_p11 }
  0x23   :  { %202 = vmatprep.subr.mxu0 %v49_v3  ;;  %217 = vmatprep.subr.mxu1 %v49_v3 }
  0x24   :  { %203 = vmatpush3.msra.mxu0 %v49_v3  ;;  %223 = vmatpush3.msra.mxu1 %v49_v3  ;;  %p279_p0 = pnand %p278_p13, %p272_p10 }
  0x25   :  { %204 = vmatprep.subr.mxu0 %v48_v4  ;;  %218 = vmatprep.subr.mxu1 %v48_v4 }
  0x26   :  { %205 = vmatpush3.msra.mxu0 %v48_v4  ;;  %224 = vmatpush3.msra.mxu1 %v48_v4 }
  0x27   :  { %206 = vmatprep.subr.mxu0 %v47_v5  ;;  %219 = vmatprep.subr.mxu1 %v47_v5 }
  0x28   :  { %207 = vmatpush3.msra.mxu0 %v47_v5  ;;  %225 = vmatpush3.msra.mxu1 %v47_v5 }
  0x29   :  { %208 = vmatprep.mubr.msk.f32.mxu0 %vm60_vm0, %v43_v6  ;;  %211 = vmatprep.mubr.msk.f32.mxu1 %vm60_vm0, %v45_v7 }
  0x2a   :  { %209 = vmatmul.mubr.msk.f32.vlgmr.msra.gmra.mxu0 %vm60_vm0, %v44_v8  ;;  %212 = vmatmul.mubr.msk.f32.vlgmr.msra.gmra.mxu1 %vm60_vm0, %v46_v9 }
  0xea   :  { %v210_v11 = vpop.f32.mrf.mxu0  ;;  %v213_v12 = vpop.f32.mrf.mxu1 }
  0xeb   :  { %v145_v13 = vadd.f32 %v210_v11, %v181_v10  ;;  %v155_v14 = vadd.f32 %v213_v12, %v181_v10 }
  0xec   :  { %v139_v15 = vpop.f32.mrf.mxu0  ;;  %v149_v16 = vpop.f32.mrf.mxu1 }
  0xed   :  { %160 = vst.msk [vmem:[#allocation7 + $0x8] sm:$0xff] %vm158_vm1, %v145_v13  ;;  %162 = vst.msk [vmem:[#allocation7 + $0x18] sm:$0xff] %vm158_vm1, %v155_v14  ;;  %v140_v17 = vadd.f32 %v181_v10, %v139_v15  ;;  %v150_v18 = vadd.f32 %v181_v10, %v149_v16 }
  0xef   :  { %159 = vst.msk [vmem:[#allocation7] sm:$0xff] %vm158_vm1, %v140_v17  ;;  %161 = vst.msk [vmem:[#allocation7 + $0x10] sm:$0xff] %vm158_vm1, %v150_v18 }
  0xf0   :  { %282 = shalt.err (!%p279_p0)
}
  0xf1   :  { %174 = dma.vmem_to_hbm [thread:$0]  %s169_s25, 512, %s346_s3, [#allocation4], %s298_s15, %s298_s15, %s299_s16  }
  0xf2   :  { %295 = dma.done.wait [#allocation4], 512  }
  0xf3   :  { %296 = vsyncadd [#allocation4], 4294966784 }
  0xf4   :  { %178 = vsyncpa [#allocation3], 1 }
  0xf5   :  { %179 = vsyncpa [#allocation6], 1 }
  0xf6   :  { %180 = vsyncpa [#allocation4], 1 }

</bundles_post_ra>
